<compile_context>
chip_gen: v6e
topology: v6e:2x2x1
jax: 0.10.0
libtpu: 0.0.40
codegen_flags: <defaults>
</compile_context>

<pallas_src>
import jax
import jax.numpy as jnp
from jax.experimental import pallas as pl
from jax.experimental.pallas import tpu as pltpu

LANE = 128
OUT_LANES = 128


def _round_up(n, m):
    return ((n + m - 1) // m) * m


# ----------------------------------------------------------------------------
# Pallas kernel: fused fc1 -> ReLU -> fc2 -> ReLU -> (fc3 as VPU reduction)
# ----------------------------------------------------------------------------
def _critic_mlp_kernel(x_ref, w1_ref, b1_ref, w2_ref, b2_ref, w3_ref, b3_ref,
                       o_ref):
    x = x_ref[...]                                               # [TB, D_in_p]

    # fc1 on the MXU, f32 accumulation; bias + ReLU in f32 on the VPU.
    h1 = jnp.dot(x, w1_ref[...], preferred_element_type=jnp.float32)
    h1 = jnp.maximum(h1 + b1_ref[...], 0.0)                      # [TB, H_p] f32

    # fc2 on the MXU (cast back to compute dtype for the dot operands).
    h2 = jnp.dot(h1.astype(w2_ref.dtype), w2_ref[...],
                 preferred_element_type=jnp.float32)
    h2 = jnp.maximum(h2 + b2_ref[...], 0.0)                      # [TB, H_p] f32

    # fc3: avoid an N=1 MXU matmul -> elementwise multiply + lane reduction.
    q = jnp.sum(h2 * w3_ref[...], axis=-1, keepdims=True) + b3_ref[...]  # [TB,1]

    # Lane-dense store: broadcast q across 128 output lanes (wrapper slices
    # column 0), so the store path uses unmasked full-width vst.
    o_ref[...] = jnp.broadcast_to(q, o_ref.shape).astype(o_ref.dtype)


# ----------------------------------------------------------------------------
# Wrapper
# ----------------------------------------------------------------------------
def pad_params(params):
    """Zero-pad logical params to 128-lane-aligned shapes (done once, host-side)."""
    w1, b1, w2, b2, w3, b3 = params
    d_in, H = w1.shape
    d_in_p = _round_up(d_in, LANE)
    H_p = _round_up(H, LANE)

    w1p = jnp.zeros((d_in_p, H_p), jnp.float32).at[:d_in, :H].set(w1)
    b1p = jnp.zeros((1, H_p), jnp.float32).at[:, :H].set(b1)
    w2p = jnp.zeros((H_p, H_p), jnp.float32).at[:H, :H].set(w2)
    b2p = jnp.zeros((1, H_p), jnp.float32).at[:, :H].set(b2)
    # fc3 weight stored as a (1, H_p) row for the VPU reduction; pad cols = 0.
    w3p = jnp.zeros((1, H_p), jnp.float32).at[:, :H].set(w3.reshape(1, H))
    b3p = b3.reshape(1, 1).astype(jnp.float32)
    return (w1p, b1p, w2p, b2p, w3p, b3p), d_in


def critic_maddpg_forward(s_a, padded_params, *, block_b=256,
                          compute_dtype=jnp.float32):
    """Run the fused critic MLP.  s_a: [B, d_in] float32 -> [B, 1] float32."""
    (w1, b1, w2, b2, w3, b3), d_in = padded_params
    B = s_a.shape[0]
    d_in_p, H_p = w1.shape

    # Batch tile: multiple of 8 (f32 sublane); at least one full tile.
    TB = _round_up(min(block_b, _round_up(max(B, 1), 8)), 8)
    num_tiles = pl.cdiv(B, TB)
    B_p = num_tiles * TB

    # Pad activations (rows to B_p, features to d_in_p) and cast matmul
    # operands to the compute dtype (bf16 on v6e/v7x halves HBM traffic;
    # accumulation stays f32 inside the kernel).
    x = jnp.zeros((B_p, d_in_p), compute_dtype).at[:B, :d_in].set(
        s_a.astype(compute_dtype))
    w1c = w1.astype(compute_dtype)
    w2c = w2.astype(compute_dtype)

    itemsize = jnp.dtype(compute_dtype).itemsize
    flops = 2 * B_p * (d_in_p * H_p + H_p * H_p + H_p)
    bytes_accessed = (B_p * d_in_p * itemsize                       # x
                      + (d_in_p * H_p + H_p * H_p) * itemsize       # W1, W2
                      + (3 * H_p + 1) * 4                           # b1, b2, W3, b3
                      + B_p * OUT_LANES * 4)                        # q (lane-dense)

    # VMEM budget (v7x: 64 MiB phys / 32 MiB default scoped): per-step blocks are
    # 2*(TB*d_in_p + TB*OUT_LANES)*itemsize + weights; at TB<=512, d_in_p/H_p=128
    # this is < 2 MiB, comfortably inside the default scoped limit on all chips.
    out_padded = pl.pallas_call(
        _critic_mlp_kernel,
        out_shape=jax.ShapeDtypeStruct((B_p, OUT_LANES), jnp.float32),
        grid=(num_tiles,),
        in_specs=[
            pl.BlockSpec((TB, d_in_p), lambda i: (i, 0)),    # x: tiled over batch
            pl.BlockSpec((d_in_p, H_p), lambda i: (0, 0)),   # W1: resident
            pl.BlockSpec((1, H_p), lambda i: (0, 0)),        # b1: resident
            pl.BlockSpec((H_p, H_p), lambda i: (0, 0)),      # W2: resident
            pl.BlockSpec((1, H_p), lambda i: (0, 0)),        # b2: resident
            pl.BlockSpec((1, H_p), lambda i: (0, 0)),        # W3 row: resident
            pl.BlockSpec((1, 1), lambda i: (0, 0)),          # b3: resident
        ],
        out_specs=pl.BlockSpec((TB, OUT_LANES), lambda i: (i, 0)),
        compiler_params=pltpu.CompilerParams(
            dimension_semantics=("parallel",)),
        cost_estimate=pl.CostEstimate(flops=flops, transcendentals=0,
                                      bytes_accessed=bytes_accessed),
    )(x, w1c, b1, w2c, b2, w3, b3)

    return out_padded[:B, :1]


# ----------------------------------------------------------------------------
# Deterministic parameter init (mimics orthogonal_init: orthogonal W, zero b)
# ----------------------------------------------------------------------------
def _orthogonal(key, out_features, in_features, gain=1.0):
    rows, cols = out_features, in_features
    flat = jax.random.normal(key, (max(rows, cols), min(rows, cols)),
                             dtype=jnp.float32)
    q, r = jnp.linalg.qr(flat)
    q = q * jnp.sign(jnp.diag(r))
    if rows < cols:
        q = q.T
    w = gain * q[:rows, :cols]                      # (out, in) like PyTorch
    return w.T                                      # stored as (in, out)


def make_params(key, d_in, hidden_dim):
    k1, k2, k3 = jax.random.split(key, 3)
    w1 = _orthogonal(k1, hidden_dim, d_in)          # (d_in, H)
    b1 = jnp.zeros((1, hidden_dim), jnp.float32)
    w2 = _orthogonal(k2, hidden_dim, hidden_dim)    # (H, H)
    b2 = jnp.zeros((1, hidden_dim), jnp.float32)
    w3 = _orthogonal(k3, 1, hidden_dim)             # (H, 1)
    b3 = jnp.zeros((1, 1), jnp.float32)
    return w1, b1, w2, b2, w3, b3


# ----------------------------------------------------------------------------
# Pure-JAX reference for sanity checking
# ----------------------------------------------------------------------------
def critic_ref(s_a, params):
    w1, b1, w2, b2, w3, b3 = params
    q = jnp.maximum(s_a @ w1 + b1, 0.0)
    q = jnp.maximum(q @ w2 + b2, 0.0)
    return q @ w3 + b3


if __name__ == "__main__":
    key = jax.random.PRNGKey(0)

    # Small synthetic MADDPG setup: 3 agents.
    batch = 8
    obs_dim_n = [12, 12, 12]
    action_dim_n = [4, 4, 4]
    hidden_dim = 32
    d_in = sum(obs_dim_n) + sum(action_dim_n)       # 48

    k_params, k_s, k_a, k_big = jax.random.split(key, 4)
    params = make_params(k_params, d_in, hidden_dim)
    padded_params = pad_params(params)              # pad once, host-side

    # Per-agent observation / action lists (as the PyTorch forward expects).
    s_keys = jax.random.split(k_s, len(obs_dim_n))
    a_keys = jax.random.split(k_a, len(action_dim_n))
    s = [jax.random.normal(sk, (batch, d), jnp.float32)
         for sk, d in zip(s_keys, obs_dim_n)]
    a = [jax.random.normal(ak, (batch, d), jnp.float32)
         for ak, d in zip(a_keys, action_dim_n)]

    # Glue (concat along feature axis) stays in plain JAX.
    s_cat = jnp.concatenate(s, axis=1)
    a_cat = jnp.concatenate(a, axis=1)
    s_a = jnp.concatenate([s_cat, a_cat], axis=1)   # [B, d_in]

    # --- f32 path, tiny batch ---
    q = jax.block_until_ready(critic_maddpg_forward(s_a, padded_params))
    q_ref = critic_ref(s_a, params)
    assert q.shape == (batch, 1)
    assert jnp.allclose(q, q_ref, atol=1e-4, rtol=1e-4)

    # --- f32 path, larger non-multiple batch (exercises batch tiling/padding) ---
    big_B = 300
    s_a_big = jax.random.normal(k_big, (big_B, d_in), jnp.float32)
    q_big = jax.block_until_ready(
        critic_maddpg_forward(s_a_big, padded_params, block_b=256))
    q_big_ref = critic_ref(s_a_big, params)
    assert q_big.shape == (big_B, 1)
    assert jnp.allclose(q_big, q_big_ref, atol=1e-4, rtol=1e-4)

    # --- bf16 matmul-operand path (f32 accumulation): run + sanity check ---
    q_bf16 = jax.block_until_ready(
        critic_maddpg_forward(s_a_big, padded_params, block_b=256,
                              compute_dtype=jnp.bfloat16))
    assert q_bf16.shape == (big_B, 1)
    assert bool(jnp.all(jnp.isfinite(q_bf16)))

    print("KERNEL_OK")
</pallas_src>

<mosaic_0001>
module attributes {stable_mosaic.version = 11 : i64} {
  func.func @_critic_mlp_kernel(%arg0: i32, %arg1: memref<8x128xf32, #tpu.memory_space<vmem>>, %arg2: memref<128x128xf32, #tpu.memory_space<vmem>>, %arg3: memref<1x128xf32, #tpu.memory_space<vmem>>, %arg4: memref<128x128xf32, #tpu.memory_space<vmem>>, %arg5: memref<1x128xf32, #tpu.memory_space<vmem>>, %arg6: memref<1x128xf32, #tpu.memory_space<vmem>>, %arg7: memref<1x1xf32, #tpu.memory_space<vmem>>, %arg8: memref<8x128xf32, #tpu.memory_space<vmem>>) attributes {dimension_semantics = [#tpu.dimension_semantics<parallel>], iteration_bounds = array<i64: 1>, scalar_prefetch = 0 : i64, scratch_operands = 0 : i64, tpu.core_type = #tpu.core_type<tc>, window_params = [{transform_indices = @transform_0, window_bounds = array<i64: 8, 128>}, {pipeline_mode = #tpu.pipeline_mode<synchronous>, transform_indices = @transform_1, window_bounds = array<i64: 128, 128>}, {pipeline_mode = #tpu.pipeline_mode<synchronous>, transform_indices = @transform_2, window_bounds = array<i64: 1, 128>}, {pipeline_mode = #tpu.pipeline_mode<synchronous>, transform_indices = @transform_3, window_bounds = array<i64: 128, 128>}, {pipeline_mode = #tpu.pipeline_mode<synchronous>, transform_indices = @transform_4, window_bounds = array<i64: 1, 128>}, {pipeline_mode = #tpu.pipeline_mode<synchronous>, transform_indices = @transform_5, window_bounds = array<i64: 1, 128>}, {pipeline_mode = #tpu.pipeline_mode<synchronous>, transform_indices = @transform_6, window_bounds = array<i64: 1, 1>}, {transform_indices = @transform_7, window_bounds = array<i64: 8, 128>}]} {
    %c0 = arith.constant 0 : index
    %c0_0 = arith.constant 0 : index
    %0 = vector.load %arg1[%c0, %c0_0] : memref<8x128xf32, #tpu.memory_space<vmem>>, vector<8x128xf32>
    %c0_1 = arith.constant 0 : index
    %c0_2 = arith.constant 0 : index
    %1 = vector.load %arg2[%c0_1, %c0_2] : memref<128x128xf32, #tpu.memory_space<vmem>>, vector<128x128xf32>
    %cst = arith.constant dense<0.000000e+00> : vector<8x128xf32>
    %2 = tpu.matmul %0, %1, %cst {dimension_numbers = #tpu.dot_dimension_numbers<[1], [0], [0], [1], [0, 0, 1, 1], [], []>} : vector<8x128xf32>, vector<128x128xf32>, vector<8x128xf32> -> vector<8x128xf32>
    %c0_3 = arith.constant 0 : index
    %c0_4 = arith.constant 0 : index
    %3 = vector.load %arg3[%c0_3, %c0_4] : memref<1x128xf32, #tpu.memory_space<vmem>>, vector<1x128xf32>
    %4 = vector.broadcast %3 : vector<1x128xf32> to vector<8x128xf32>
    %5 = arith.addf %2, %4 : vector<8x128xf32>
    %cst_5 = arith.constant 0.000000e+00 : f32
    %6 = vector.broadcast %cst_5 : f32 to vector<8x128xf32>
    %7 = arith.maximumf %5, %6 : vector<8x128xf32>
    %c0_6 = arith.constant 0 : index
    %c0_7 = arith.constant 0 : index
    %8 = vector.load %arg4[%c0_6, %c0_7] : memref<128x128xf32, #tpu.memory_space<vmem>>, vector<128x128xf32>
    %cst_8 = arith.constant dense<0.000000e+00> : vector<8x128xf32>
    %9 = tpu.matmul %7, %8, %cst_8 {dimension_numbers = #tpu.dot_dimension_numbers<[1], [0], [0], [1], [0, 0, 1, 1], [], []>} : vector<8x128xf32>, vector<128x128xf32>, vector<8x128xf32> -> vector<8x128xf32>
    %c0_9 = arith.constant 0 : index
    %c0_10 = arith.constant 0 : index
    %10 = vector.load %arg5[%c0_9, %c0_10] : memref<1x128xf32, #tpu.memory_space<vmem>>, vector<1x128xf32>
    %11 = vector.broadcast %10 : vector<1x128xf32> to vector<8x128xf32>
    %12 = arith.addf %9, %11 : vector<8x128xf32>
    %cst_11 = arith.constant 0.000000e+00 : f32
    %13 = vector.broadcast %cst_11 : f32 to vector<8x128xf32>
    %14 = arith.maximumf %12, %13 : vector<8x128xf32>
    %c0_12 = arith.constant 0 : index
    %c0_13 = arith.constant 0 : index
    %15 = vector.load %arg6[%c0_12, %c0_13] : memref<1x128xf32, #tpu.memory_space<vmem>>, vector<1x128xf32>
    %16 = vector.broadcast %15 : vector<1x128xf32> to vector<8x128xf32>
    %17 = arith.mulf %14, %16 : vector<8x128xf32>
    %cst_14 = arith.constant dense<0.000000e+00> : vector<8xf32>
    %18 = vector.multi_reduction <add>, %17, %cst_14 [1] : vector<8x128xf32> to vector<8xf32>
    %19 = vector.shape_cast %18 : vector<8xf32> to vector<8x1xf32>
    %c0_15 = arith.constant 0 : index
    %c0_16 = arith.constant 0 : index
    %20 = vector.load %arg7[%c0_15, %c0_16] : memref<1x1xf32, #tpu.memory_space<vmem>>, vector<1x1xf32>
    %21 = vector.broadcast %20 : vector<1x1xf32> to vector<8x1xf32>
    %22 = arith.addf %19, %21 : vector<8x1xf32>
    %23 = vector.shape_cast %22 : vector<8x1xf32> to vector<8x1xf32>
    %24 = vector.broadcast %23 : vector<8x1xf32> to vector<8x128xf32>
    %c0_17 = arith.constant 0 : index
    %c0_18 = arith.constant 0 : index
    %25 = vector.load %arg8[%c0_17, %c0_18] : memref<8x128xf32, #tpu.memory_space<vmem>>, vector<8x128xf32>
    tpu.vector_store %arg8[%c0_17, %c0_18], %24 {strides = array<i32>} : memref<8x128xf32, #tpu.memory_space<vmem>>, vector<8x128xf32>,
    return
  }
  func.func @transform_0(%arg0: i32) -> (i32, i32) {
    %c0_i32 = arith.constant 0 : i32
    %c0_i32_0 = arith.constant 0 : i32
    return %arg0, %c0_i32 : i32, i32
  }
  func.func @transform_1(%arg0: i32) -> (i32, i32) {
    %c0_i32 = arith.constant 0 : i32
    %c0_i32_0 = arith.constant 0 : i32
    %c0_i32_1 = arith.constant 0 : i32
    return %c0_i32, %c0_i32_0 : i32, i32
  }
  func.func @transform_2(%arg0: i32) -> (i32, i32) {
    %c0_i32 = arith.constant 0 : i32
    %c0_i32_0 = arith.constant 0 : i32
    %c0_i32_1 = arith.constant 0 : i32
    return %c0_i32, %c0_i32_0 : i32, i32
  }
  func.func @transform_3(%arg0: i32) -> (i32, i32) {
    %c0_i32 = arith.constant 0 : i32
    %c0_i32_0 = arith.constant 0 : i32
    %c0_i32_1 = arith.constant 0 : i32
    return %c0_i32, %c0_i32_0 : i32, i32
  }
  func.func @transform_4(%arg0: i32) -> (i32, i32) {
    %c0_i32 = arith.constant 0 : i32
    %c0_i32_0 = arith.constant 0 : i32
    %c0_i32_1 = arith.constant 0 : i32
    return %c0_i32, %c0_i32_0 : i32, i32
  }
  func.func @transform_5(%arg0: i32) -> (i32, i32) {
    %c0_i32 = arith.constant 0 : i32
    %c0_i32_0 = arith.constant 0 : i32
    %c0_i32_1 = arith.constant 0 : i32
    return %c0_i32, %c0_i32_0 : i32, i32
  }
  func.func @transform_6(%arg0: i32) -> (i32, i32) {
    %c0_i32 = arith.constant 0 : i32
    %c0_i32_0 = arith.constant 0 : i32
    %c0_i32_1 = arith.constant 0 : i32
    return %c0_i32, %c0_i32_0 : i32, i32
  }
  func.func @transform_7(%arg0: i32) -> (i32, i32) {
    %c0_i32 = arith.constant 0 : i32
    %c0_i32_0 = arith.constant 0 : i32
    return %arg0, %c0_i32 : i32, i32
  }
}

</mosaic_0001>

<bundles_post_ra>
// kernel: tpu_custom_call.1
= control target key start
LH: loop header
LB: loop body
LE: loop exit
PB: predicated region body
PF: predicated region fallthrough
CT: control target
= control target key end

     0   :  { %s608_s0 = inlined_call_operand.hbm [shape: f32[8,128], index: 0, kind: input, shape index: {}]   ;;  %s609_s1 = inlined_call_operand.hbm [shape: f32[128,128], index: 1, kind: input, shape index: {}]   ;;  %s610_s2 = inlined_call_operand.vmem [shape: f32[1,128], index: 2, kind: input, shape index: {}]   ;;  %s611_s3 = inlined_call_operand.hbm [shape: f32[128,128], index: 3, kind: input, shape index: {}]   ;;  %s612_s4 = inlined_call_operand.vmem [shape: f32[1,128], index: 4, kind: input, shape index: {}]   ;;  %s613_s5 = inlined_call_operand.vmem [shape: f32[1,128], index: 5, kind: input, shape index: {}]   ;;  %s614_s6 = inlined_call_operand.<no memory space> [shape: f32[1,1], index: 6, kind: input, shape index: {}]   ;;  %s615_s7 = inlined_call_operand.hbm [shape: f32[8,128], index: 7, kind: output, shape index: {}]  }
   0x1   :  { %v12_v0 = vstv %s614_s6 }
   0x2   :  { %13 = vst [vmem:[#allocation2] sm:$0x1] %v12_v0 }
   0x3   :  { %14 = vsyncpa [#allocation4], 0 }
   0x4   :  { %15 = vsyncpa [#allocation7], 0 }
   0x5   :  { %16 = vsyncpa [#allocation5], 0  ;;  %s501_s26 = smov [#allocation6]  }
   0x6   :  { %s32_s27 = sshll.u32 %s501_s26, 4  ;;  %s33_s27 = int_to_ptr.vmem [resolvable:$true] %s32_s27 }
   0x7   :  { %s423_s28 = scalar_lea.vmem %s33_s27, 2048  ;;  %p428_p1 = scmp.lt.s32.totalorder %s33_s27, %s33_s27 }
   0x8   :  { %p424_p0 = scmp.ne.s32.totalorder %s33_s27, %s423_s28  ;;  %p429_p2 = scmp.lt.s32.totalorder %s423_s28, %s423_s28 }
   0xa   :  { %p430_p3 = por %p429_p2, %p428_p1 }
   0xc   :  { %p431_p4 = pnand %p430_p3, %p424_p0 }
   0xe   :  { %434 = shalt.err (!%p431_p4)
}
   0xf   :  { %s502_s29 = smov 128   ;;  %s503_s30 = smov 8  }
  0x10   :  { %38 = dma.hbm_to_vmem [thread:$0]  %s609_s1, 2048, %s33_s27, [#allocation7], %s502_s29, %s502_s29, %s503_s30  }
  0x11   :  { %s504_s6 = smov [#allocation3]   ;;  %s505_s11 = smov [#allocation8]  }
  0x12   :  { %s23_s10 = sshll.u32 %s504_s6, 4  ;;  %s46_s12 = sshll.u32 %s505_s11, 4  ;;  %s24_s10 = int_to_ptr.vmem [resolvable:$true] %s23_s10  ;;  %s47_s12 = int_to_ptr.vmem [resolvable:$true] %s46_s12 }
  0x13   :  { %s443_s13 = scalar_lea.vmem %s24_s10, 128  ;;  %p448_p6 = scmp.lt.s32.totalorder %s24_s10, %s24_s10 }
  0x14   :  { %p444_p5 = scmp.ne.s32.totalorder %s24_s10, %s443_s13  ;;  %p449_p7 = scmp.lt.s32.totalorder %s443_s13, %s443_s13 }
  0x16   :  { %p450_p8 = por %p449_p7, %p448_p6 }
  0x18   :  { %p451_p9 = pnand %p450_p8, %p444_p5 }
  0x1a   :  { %454 = shalt.err (!%p451_p9)
}
  0x1b   :  { %26 = dma.hbm_to_vmem [thread:$0]  %s608_s0, 128, %s24_s10, [#allocation4]  }
  0x1c   :  { %s463_s16 = scalar_lea.vmem %s47_s12, 2048  ;;  %p468_p11 = scmp.lt.s32.totalorder %s47_s12, %s47_s12 }
  0x1d   :  { %p464_p10 = scmp.ne.s32.totalorder %s47_s12, %s463_s16  ;;  %p469_p12 = scmp.lt.s32.totalorder %s463_s16, %s463_s16 }
  0x1f   :  { %p470_p13 = por %p469_p12, %p468_p11 }
  0x21   :  { %p471_p0 = pnand %p470_p13, %p464_p10 }
  0x23   :  { %474 = shalt.err (!%p471_p0)
}
  0x24   :  { %52 = dma.hbm_to_vmem [thread:$0]  %s611_s3, 2048, %s47_s12, [#allocation7], %s502_s29, %s502_s29, %s503_s30  }
  0x25   :  { %495 = dma.done.wait [#allocation4], 128  }
  0x26   :  { %496 = vsyncadd [#allocation4], 4294967168 }
  0x27   :  { %497 = dma.done.wait [#allocation7], 4096  }
  0x28   :  { %498 = vsyncadd [#allocation7], 4294963200  ;;  %v506_v1 = vmov 0.0   ;;  %vm507_vm0 = vmmov 0   ;;  %v84_v2 = vld [vmem:[#allocation6 + $0x78] sm:$0xff]  ;;  %v83_v3 = vld [vmem:[#allocation6 + $0x70] sm:$0xff] }
  0x29   :  { %335 = vmatprep.subr.mxu0 %v506_v1  ;;  %367 = vmatprep.mubr.msk.f32.mxu0 %vm507_vm0, %v506_v1  ;;  %v82_v4 = vld [vmem:[#allocation6 + $0x68] sm:$0xff]  ;;  %v81_v5 = vld [vmem:[#allocation6 + $0x60] sm:$0xff]  ;;  %v178_v6 = vld [vmem:[#allocation8 + $0x78] sm:$0xff]  ;;  %v508_v47 = vmov 0  }
  0x2a   :  { %370 = vmatprep.subr.mxu1 %v506_v1  ;;  %402 = vmatprep.mubr.msk.f32.mxu1 %vm507_vm0, %v506_v1  ;;  %v80_v7 = vld [vmem:[#allocation6 + $0x58] sm:$0xff]  ;;  %v177_v8 = vld [vmem:[#allocation8 + $0x70] sm:$0xff]  ;;  %v176_v9 = vld [vmem:[#allocation8 + $0x68] sm:$0xff] }
  0x2b   :  { %336 = vmatpush3.msra.mxu0 %v84_v2  ;;  %371 = vmatpush3.msra.mxu1 %v178_v6  ;;  %v79_v10 = vld [vmem:[#allocation6 + $0x50] sm:$0xff]  ;;  %v175_v11 = vld [vmem:[#allocation8 + $0x60] sm:$0xff]  ;;  %v78_v12 = vld [vmem:[#allocation6 + $0x48] sm:$0xff] }
  0x2c   :  { %337 = vmatprep.subr.mxu0 %v506_v1  ;;  %372 = vmatprep.subr.mxu1 %v506_v1  ;;  %v174_v13 = vld [vmem:[#allocation8 + $0x58] sm:$0xff]  ;;  %v77_v14 = vld [vmem:[#allocation6 + $0x40] sm:$0xff]  ;;  %v173_v15 = vld [vmem:[#allocation8 + $0x50] sm:$0xff] }
  0x2d   :  { %338 = vmatpush3.msra.mxu0 %v83_v3  ;;  %373 = vmatpush3.msra.mxu1 %v177_v8  ;;  %v76_v16 = vld [vmem:[#allocation6 + $0x38] sm:$0xff]  ;;  %v172_v17 = vld [vmem:[#allocation8 + $0x48] sm:$0xff]  ;;  %v75_v18 = vld [vmem:[#allocation6 + $0x30] sm:$0xff] }
  0x2e   :  { %339 = vmatprep.subr.mxu0 %v506_v1  ;;  %374 = vmatprep.subr.mxu1 %v506_v1  ;;  %v171_v19 = vld [vmem:[#allocation8 + $0x40] sm:$0xff]  ;;  %v74_v20 = vld [vmem:[#allocation6 + $0x28] sm:$0xff]  ;;  %v170_v21 = vld [vmem:[#allocation8 + $0x38] sm:$0xff] }
  0x2f   :  { %340 = vmatpush3.msra.mxu0 %v82_v4  ;;  %375 = vmatpush3.msra.mxu1 %v176_v9  ;;  %v73_v22 = vld [vmem:[#allocation6 + $0x20] sm:$0xff]  ;;  %v169_v23 = vld [vmem:[#allocation8 + $0x30] sm:$0xff]  ;;  %v72_v24 = vld [vmem:[#allocation6 + $0x18] sm:$0xff] }
  0x30   :  { %341 = vmatprep.subr.mxu0 %v506_v1  ;;  %376 = vmatprep.subr.mxu1 %v506_v1  ;;  %v168_v25 = vld [vmem:[#allocation8 + $0x28] sm:$0xff]  ;;  %v71_v26 = vld [vmem:[#allocation6 + $0x10] sm:$0xff]  ;;  %v167_v27 = vld [vmem:[#allocation8 + $0x20] sm:$0xff] }
  0x31   :  { %342 = vmatpush3.msra.mxu0 %v81_v5  ;;  %377 = vmatpush3.msra.mxu1 %v175_v11  ;;  %v70_v28 = vld [vmem:[#allocation6 + $0x8] sm:$0xff]  ;;  %v166_v29 = vld [vmem:[#allocation8 + $0x18] sm:$0xff]  ;;  %v69_v30 = vld [vmem:[#allocation6] sm:$0xff] }
  0x32   :  { %343 = vmatprep.subr.mxu0 %v506_v1  ;;  %378 = vmatprep.subr.mxu1 %v506_v1  ;;  %v68_v31 = vld [vmem:[#allocation3] sm:$0xff]  ;;  %v165_v32 = vld [vmem:[#allocation8 + $0x10] sm:$0xff]  ;;  %v164_v33 = vld [vmem:[#allocation8 + $0x8] sm:$0xff] }
  0x33   :  { %344 = vmatpush3.msra.mxu0 %v80_v7  ;;  %379 = vmatpush3.msra.mxu1 %v174_v13  ;;  %v163_v34 = vld [vmem:[#allocation8] sm:$0xff]  ;;  %v297_v35 = vld [vmem:[%s610_s2] ss:$0 sm:$0xff]  ;;  %s509_s2 = smov [#allocation9]  }
  0x34   :  { %345 = vmatprep.subr.mxu0 %v506_v1  ;;  %380 = vmatprep.subr.mxu1 %v506_v1  ;;  %v298_v40 = vld [vmem:[%s612_s4] ss:$0 sm:$0xff]  ;;  %s287_s22 = sshll.u32 %s509_s2, 4  ;;  %s288_s22 = int_to_ptr.vmem [resolvable:$true] %s287_s22 }
  0x35   :  { %346 = vmatpush3.msra.mxu0 %v79_v10  ;;  %381 = vmatpush3.msra.mxu1 %v173_v15  ;;  %v299_v44 = vld [vmem:[%s613_s5] ss:$0 sm:$0xff]  ;;  %s475_s4 = scalar_lea.vmem %s288_s22, 128  ;;  %p480_p2 = scmp.lt.s32.totalorder %s288_s22, %s288_s22 }
  0x36   :  { %347 = vmatprep.subr.mxu0 %v506_v1  ;;  %382 = vmatprep.subr.mxu1 %v506_v1  ;;  %v300_v48 = vld [vmem:[#allocation2] ss:$0 sm:$0xff]  ;;  %p476_p1 = scmp.ne.s32.totalorder %s288_s22, %s475_s4  ;;  %p481_p3 = scmp.lt.s32.totalorder %s475_s4, %s475_s4 }
  0x37   :  { %348 = vmatpush3.msra.mxu0 %v78_v12  ;;  %383 = vmatpush3.msra.mxu1 %v172_v17 }
  0x38   :  { %349 = vmatprep.subr.mxu0 %v506_v1  ;;  %384 = vmatprep.subr.mxu1 %v506_v1  ;;  %p482_p4 = por %p481_p3, %p480_p2 }
  0x39   :  { %350 = vmatpush3.msra.mxu0 %v77_v14  ;;  %385 = vmatpush3.msra.mxu1 %v171_v19 }
  0x3a   :  { %351 = vmatprep.subr.mxu0 %v506_v1  ;;  %386 = vmatprep.subr.mxu1 %v506_v1  ;;  %p483_p5 = pnand %p482_p4, %p476_p1 }
  0x3b   :  { %352 = vmatpush3.msra.mxu0 %v76_v16  ;;  %387 = vmatpush3.msra.mxu1 %v170_v21 }
  0x3c   :  { %353 = vmatprep.subr.mxu0 %v506_v1  ;;  %388 = vmatprep.subr.mxu1 %v506_v1 }
  0x3d   :  { %354 = vmatpush3.msra.mxu0 %v75_v18  ;;  %389 = vmatpush3.msra.mxu1 %v169_v23 }
  0x3e   :  { %355 = vmatprep.subr.mxu0 %v506_v1  ;;  %390 = vmatprep.subr.mxu1 %v506_v1 }
  0x3f   :  { %356 = vmatpush3.msra.mxu0 %v74_v20  ;;  %391 = vmatpush3.msra.mxu1 %v168_v25 }
  0x40   :  { %357 = vmatprep.subr.mxu0 %v506_v1  ;;  %392 = vmatprep.subr.mxu1 %v506_v1 }
  0x41   :  { %358 = vmatpush3.msra.mxu0 %v73_v22  ;;  %393 = vmatpush3.msra.mxu1 %v167_v27 }
  0x42   :  { %359 = vmatprep.subr.mxu0 %v506_v1  ;;  %394 = vmatprep.subr.mxu1 %v506_v1 }
  0x43   :  { %360 = vmatpush3.msra.mxu0 %v72_v24  ;;  %395 = vmatpush3.msra.mxu1 %v166_v29 }
  0x44   :  { %361 = vmatprep.subr.mxu0 %v506_v1  ;;  %396 = vmatprep.subr.mxu1 %v506_v1 }
  0x45   :  { %362 = vmatpush3.msra.mxu0 %v71_v26  ;;  %397 = vmatpush3.msra.mxu1 %v165_v32 }
  0x46   :  { %363 = vmatprep.subr.mxu0 %v506_v1  ;;  %398 = vmatprep.subr.mxu1 %v506_v1 }
  0x47   :  { %364 = vmatpush3.msra.mxu0 %v70_v28  ;;  %399 = vmatpush3.msra.mxu1 %v164_v33 }
  0x48   :  { %365 = vmatprep.subr.mxu0 %v506_v1  ;;  %400 = vmatprep.subr.mxu1 %v506_v1 }
  0x49   :  { %366 = vmatpush3.msra.mxu0 %v69_v30  ;;  %401 = vmatpush3.msra.mxu1 %v163_v34 }
  0x4a   :  { %368 = vmatmul.mubr.f32.vlgmr.msra.gmra.mxu0 %v68_v31  ;;  %414 = vset.pattern.permute.xlu0 %v508_v47 }
 0x10a   :  { %v158_v36 = vpop.f32.mrf.mxu0 }
 0x10b   :  { %v159_v37 = vadd.f32 %v297_v35, %v158_v36 }
 0x10c   :  { %v369_v38 = vpop.f32.mrf.mxu0 }
 0x10d   :  { %v162_v39 = vmax.f32 %v159_v37, 0.0 }
 0x10f   :  { %403 = vmatmul.mubr.f32.vlgmr.msra.gmra.mxu1 %v162_v39 }
 0x1cf   :  { %v252_v41 = vpop.f32.mrf.mxu1 }
 0x1d0   :  { %v253_v42 = vadd.f32 %v298_v40, %v252_v41 }
 0x1d1   :  { %v404_v43 = vpop.f32.mrf.mxu1 }
 0x1d2   :  { %v256_v45 = vmax.f32 %v253_v42, 0.0 }
 0x1d4   :  { %v264_v46 = vmul.f32 %v299_v44, %v256_v45 }
 0x1d6   :  { %265 = vadd.xlane.f32.xlu0 %v264_v46 }
 0x25f   :  { %v266_v49 = vpop.xlane.xlu0 %265 }
 0x260   :  { %v274_v50 = vadd.f32 %v300_v48, %v266_v49 }
 0x262   :  { %277 = vperm.xlu0 %414, %v274_v50  }
 0x2dd   :  { %v278_v51 = vpop.permute.xlu0 %277 }
 0x2de   :  { %280 = vst [vmem:[#allocation9] sm:$0xff] %v278_v51 }
 0x2df   :  { %486 = shalt.err (!%p483_p5)
}
 0x2e0   :  { %290 = dma.vmem_to_hbm [thread:$0]  %s288_s22, 128, %s615_s7, [#allocation5]  }
 0x2e1   :  { %499 = dma.done.wait [#allocation5], 128  }
 0x2e2   :  { %500 = vsyncadd [#allocation5], 4294967168 }
 0x2e3   :  { %294 = vsyncpa [#allocation4], 1 }
 0x2e4   :  { %295 = vsyncpa [#allocation7], 1 }
 0x2e5   :  { %296 = vsyncpa [#allocation5], 1 }

</bundles_post_ra>
